<compile_context>
chip_gen: v7x
topology: tpu7x:2x2x1
jax: 0.10.0
libtpu: 0.0.40
codegen_flags: <defaults>
</compile_context>

<pallas_src>
import jax
import jax.numpy as jnp
from jax import lax
from jax.experimental import pallas as pl
from jax.experimental.pallas import tpu as pltpu


def _round_up(x: int, m: int) -> int:
    return ((x + m - 1) // m) * m


def _round_dn(x: int, m: int) -> int:
    return (x // m) * m


def _cdiv(a: int, b: int) -> int:
    return (a + b - 1) // b


def _vmem_capacity_bytes() -> int:
    try:
        cap = int(getattr(pltpu.get_tpu_info(), "vmem_capacity_bytes"))
        if cap > 0:
            return cap
    except Exception:
        pass
    return 64 * 1024 * 1024  # conservative fallback: v7x per-TensorCore VMEM


# ----------------------------------------------------------------------------
# Kernels
# ----------------------------------------------------------------------------
def _make_simple_kernel(precision):
    # One (batch-tile, class-tile) block per grid step; F is full-extent so
    # the bias is added exactly once per output block.
    def kernel(x_ref, w_ref, b_ref, o_ref):
        acc = jnp.dot(x_ref[...], w_ref[...],
                      preferred_element_type=jnp.float32, precision=precision)
        o_ref[...] = (acc + b_ref[...].astype(jnp.float32)).astype(o_ref.dtype)
    return kernel


def _make_ksplit_kernel(precision):
    # Reduction over F is split across the innermost ("arbitrary") grid axis;
    # partial sums live in an f32 VMEM accumulator.
    def kernel(x_ref, w_ref, b_ref, o_ref, acc_ref):
        k = pl.program_id(2)

        @pl.when(k == 0)
        def _():
            acc_ref[...] = jnp.zeros_like(acc_ref)

        acc_ref[...] += jnp.dot(x_ref[...], w_ref[...],
                                preferred_element_type=jnp.float32,
                                precision=precision)

        @pl.when(k == pl.num_programs(2) - 1)
        def _():
            o_ref[...] = (acc_ref[...] +
                          b_ref[...].astype(jnp.float32)).astype(o_ref.dtype)
    return kernel


# ----------------------------------------------------------------------------
# Wrapper
# ----------------------------------------------------------------------------
def classifier_forward(
    x,
    w,
    b,
    *,
    compute_dtype=jnp.bfloat16,   # bf16 default: the kernel is W-bandwidth bound
    out_dtype=jnp.float32,        # f32 logits for the downstream CE criterion
    tile_b_max=None,              # None -> as large as the VMEM budget allows
    tile_c_max: int = 512,
    vmem_budget_bytes=None,       # None -> ~70% of this chip's VMEM capacity
):
    """Fused logits head: x @ w + b.

    x: [B, F] activations, w: [F, C] weights, b: [C] / [1, C] bias.
    Returns [B, C] logits in `out_dtype`.
    """
    B, F = x.shape
    Fw, C = w.shape
    assert F == Fw, f"feature mismatch: x has {F}, w has {Fw}"
    b = jnp.reshape(b, (1, C)).astype(jnp.float32)

    if compute_dtype is not None:
        x = x.astype(compute_dtype)   # no-op if already stored in compute_dtype
        w = w.astype(compute_dtype)
    else:
        w = w.astype(x.dtype)
    in_itemsize = x.dtype.itemsize
    out_itemsize = jnp.dtype(out_dtype).itemsize
    # Full-precision MXU passes when computing in f32 (bit-faithful logits).
    precision = lax.Precision.HIGHEST if in_itemsize >= 4 else None

    # ---- per-chip VMEM budget -------------------------------------------
    vmem_cap = _vmem_capacity_bytes()
    if vmem_budget_bytes is None:
        vmem_budget_bytes = int(vmem_cap * 0.70)   # ~90 MiB v5e/v6e, ~45 MiB v7x

    # Sub-32-bit dtypes pack rows along sublanes: 16-row multiples for bf16.
    row_align = max(8, 32 // in_itemsize)

    def footprint(tb, tc, tk, with_acc):
        fp = 2 * (tb * tk + tk * tc) * in_itemsize   # double-buffered x, w tiles
        fp += 2 * tc * 4                             # bias slab (f32)
        fp += 2 * tb * tc * out_itemsize             # output tile
        if with_acc:
            fp += tb * tc * 4                        # f32 accumulator scratch
        return fp

    def fits(tb, tc, tk, with_acc=False):
        return footprint(tb, tc, tk, with_acc) <= vmem_budget_bytes

    # ---- tile selection ---------------------------------------------------
    # Class tile: full extent when small, else lane-dense multiple of 128.
    if C <= tile_c_max:
        tile_c = C
    else:
        tile_c = max(128, _round_dn(tile_c_max, 128))

    # Batch tile: as large as the budget allows (ideally all of B) so W is
    # streamed from HBM as few times as possible.
    tile_b = B if tile_b_max is None else min(B, max(row_align, tile_b_max))
    max_tb = max(row_align,
                 _round_dn(vmem_budget_bytes // (4 * F * in_itemsize), row_align))
    tile_b = min(tile_b, max_tb)
    if tile_b < B:                                    # partial blocks -> align
        tile_b = max(row_align, _round_dn(tile_b, row_align))
    tile_b = min(tile_b, B)

    # Phase 1: shrink the class tile (prefer 256-multiples) down to 128.
    while not fits(tile_b, tile_c, F) and tile_c > 128:
        if tile_c > 256:
            tile_c = max(256, _round_dn(tile_c - 1, 256))
        else:
            tile_c = 128

    # Phase 2: shrink the batch tile, but not below 128 (keeps MXU fed).
    while not fits(tile_b, tile_c, F) and tile_b > 128:
        tile_b = max(128, _round_dn(tile_b // 2, row_align))

    # Phase 3: K(F)-split fallback instead of MXU-starving tiles.
    use_ksplit = False
    tile_k = F
    F_k = F
    if not fits(tile_b, tile_c, F):
        use_ksplit = True
        F_pad = _round_up(F, 128)
        # tile_k must divide the (possibly padded) reduction dim so no ragged
        # K edge leaks garbage into valid outputs.  Pick the largest that fits.
        tile_k = 128
        cand = 128
        while cand <= F_pad:
            if F_pad % cand == 0 and fits(tile_b, tile_c, cand, with_acc=True):
                tile_k = cand
            cand += 128
        # Absolute last resort: shrink tile_b below 128.
        while not fits(tile_b, tile_c, tile_k, with_acc=True) and tile_b > row_align:
            tile_b = max(row_align, _round_dn(tile_b // 2, row_align))
        if F_pad != F:
            # Rare fallback: zero-pad the reduction dim (exact for matmul).
            x = jnp.pad(x, ((0, 0), (0, F_pad - F)))
            w = jnp.pad(w, ((0, F_pad - F), (0, 0)))
        F_k = F_pad

    gb = _cdiv(B, tile_b)
    gc = _cdiv(C, tile_c)

    # Give the second TensorCore (v7x) / megacore work even if one block fits.
    if gb * gc == 1 and C >= 256:
        tile_c = max(128, _round_up(_cdiv(C, 2), 128))
        gc = _cdiv(C, tile_c)

    # ---- grid / specs -------------------------------------------------------
    if not use_ksplit:
        kernel = _make_simple_kernel(precision)
        # Total HBM traffic (bytes) for each inner-axis choice; re-stream the
        # cheaper operand.
        stream_w_traffic = (B * F + gb * F * C) * in_itemsize   # x resident
        stream_x_traffic = (gc * B * F + F * C) * in_itemsize   # W resident
        if stream_w_traffic <= stream_x_traffic:
            grid = (gb, gc)                       # class axis innermost
            x_map = lambda i, j: (i, 0)
            w_map = lambda i, j: (0, j)
            b_map = lambda i, j: (0, j)
            o_map = lambda i, j: (i, j)
        else:
            grid = (gc, gb)                       # batch axis innermost
            x_map = lambda j, i: (i, 0)
            w_map = lambda j, i: (0, j)
            b_map = lambda j, i: (0, j)
            o_map = lambda j, i: (i, j)
        in_specs = [pl.BlockSpec((tile_b, F), x_map),
                    pl.BlockSpec((F, tile_c), w_map),
                    pl.BlockSpec((1, tile_c), b_map)]
        out_specs = pl.BlockSpec((tile_b, tile_c), o_map)
        scratch_shapes = []
        dim_sem = ("parallel", "parallel")
        fp = footprint(tile_b, tile_c, F, with_acc=False)
    else:
        kernel = _make_ksplit_kernel(precision)
        gk = F_k // tile_k
        grid = (gb, gc, gk)
        in_specs = [pl.BlockSpec((tile_b, tile_k), lambda i, j, k: (i, k)),
                    pl.BlockSpec((tile_k, tile_c), lambda i, j, k: (k, j)),
                    pl.BlockSpec((1, tile_c), lambda i, j, k: (0, j))]
        out_specs = pl.BlockSpec((tile_b, tile_c), lambda i, j, k: (i, j))
        scratch_shapes = [pltpu.VMEM((tile_b, tile_c), jnp.float32)]
        dim_sem = ("parallel", "parallel", "arbitrary")
        fp = footprint(tile_b, tile_c, tile_k, with_acc=True)

    # Tie the compiler's scoped-VMEM limit to the actual footprint (+ headroom)
    # so it works under v7x's 64 MiB while still allowing big tiles elsewhere.
    vmem_limit = int(min(vmem_cap, max(fp + 8 * 1024 * 1024, 24 * 1024 * 1024)))

    out = pl.pallas_call(
        kernel,
        out_shape=jax.ShapeDtypeStruct((B, C), out_dtype),
        grid_spec=pltpu.PrefetchScalarGridSpec(
            num_scalar_prefetch=0,
            grid=grid,
            in_specs=in_specs,
            out_specs=out_specs,
            scratch_shapes=scratch_shapes,
        ),
        compiler_params=pltpu.CompilerParams(
            dimension_semantics=dim_sem,
            vmem_limit_bytes=vmem_limit,
        ),
    )(x, w, b)
    return out


if __name__ == "__main__":
    key = jax.random.PRNGKey(0)
    kx, kw, kb, kx2, kw2, kb2, kx4, kw4, kb4 = jax.random.split(key, 9)

    # --- check 1: small classifier head, default bf16 path ------------------
    B, F, C = 16, 32, 8
    x = jax.random.normal(kx, (B, F), dtype=jnp.float32)
    w = jax.random.normal(kw, (F, C), dtype=jnp.float32) * 0.05
    b = jax.random.normal(kb, (1, C), dtype=jnp.float32) * 0.01

    logits = classifier_forward(x, w, b)
    jax.block_until_ready(logits)
    ref = x @ w + b
    assert logits.shape == (B, C)
    assert jnp.allclose(logits, ref, atol=5e-2, rtol=5e-2)

    # --- check 2: ragged B and C, multi-tile grid, NO host-side padding -----
    B2, F2, C2 = 40, 64, 200
    x2 = jax.random.normal(kx2, (B2, F2), dtype=jnp.float32)
    w2 = jax.random.normal(kw2, (F2, C2), dtype=jnp.float32) * 0.05
    b2 = jax.random.normal(kb2, (1, C2), dtype=jnp.float32) * 0.01

    logits2 = classifier_forward(x2, w2, b2, tile_b_max=16, tile_c_max=128)
    jax.block_until_ready(logits2)
    ref2 = x2 @ w2 + b2
    assert logits2.shape == (B2, C2)
    assert jnp.allclose(logits2, ref2, atol=5e-2, rtol=5e-2)

    # --- check 3: f32 compute path (precision=HIGHEST), full-extent blocks --
    logits3 = classifier_forward(x2, w2, b2, compute_dtype=jnp.float32)
    jax.block_until_ready(logits3)
    ref3 = jnp.dot(x2, w2, precision=lax.Precision.HIGHEST) + b2
    assert logits3.shape == (B2, C2)
    assert jnp.allclose(logits3, ref3, atol=1e-5, rtol=1e-5)

    # --- check 4: K(F)-split fallback (forced via a tiny VMEM budget) -------
    B4, F4, C4 = 32, 256, 256
    x4 = jax.random.normal(kx4, (B4, F4), dtype=jnp.float32)
    w4 = jax.random.normal(kw4, (F4, C4), dtype=jnp.float32) * 0.05
    b4 = jax.random.normal(kb4, (1, C4), dtype=jnp.float32) * 0.01

    logits4 = classifier_forward(x4, w4, b4, compute_dtype=jnp.float32,
                                 vmem_budget_bytes=300 * 1024)
    jax.block_until_ready(logits4)
    ref4 = jnp.dot(x4, w4, precision=lax.Precision.HIGHEST) + b4
    assert logits4.shape == (B4, C4)
    assert jnp.allclose(logits4, ref4, atol=1e-4, rtol=1e-4)

    print("KERNEL_OK")
</pallas_src>

<mosaic_0001>
module attributes {stable_mosaic.version = 11 : i64} {
  func.func @kernel(%arg0: i32, %arg1: i32, %arg2: memref<16x32xbf16, #tpu.memory_space<vmem>>, %arg3: memref<32x8xbf16, #tpu.memory_space<vmem>>, %arg4: memref<1x8xf32, #tpu.memory_space<vmem>>, %arg5: memref<16x8xf32, #tpu.memory_space<vmem>>) attributes {dimension_semantics = [#tpu.dimension_semantics<parallel>, #tpu.dimension_semantics<parallel>], iteration_bounds = array<i64: 1, 1>, scalar_prefetch = 0 : i64, scratch_operands = 0 : i64, tpu.core_type = #tpu.core_type<tc>, window_params = [{transform_indices = @transform_0, window_bounds = array<i64: 16, 32>}, {transform_indices = @transform_1, window_bounds = array<i64: 32, 8>}, {transform_indices = @transform_2, window_bounds = array<i64: 1, 8>}, {transform_indices = @transform_3, window_bounds = array<i64: 16, 8>}]} {
    %c0 = arith.constant 0 : index
    %c0_0 = arith.constant 0 : index
    %0 = vector.load %arg2[%c0, %c0_0] : memref<16x32xbf16, #tpu.memory_space<vmem>>, vector<16x32xbf16>
    %c0_1 = arith.constant 0 : index
    %c0_2 = arith.constant 0 : index
    %1 = vector.load %arg3[%c0_1, %c0_2] : memref<32x8xbf16, #tpu.memory_space<vmem>>, vector<32x8xbf16>
    %cst = arith.constant dense<0.000000e+00> : vector<16x8xf32>
    %2 = tpu.matmul %0, %1, %cst {dimension_numbers = #tpu.dot_dimension_numbers<[1], [0], [0], [1], [0, 0, 1, 1], [], []>} : vector<16x32xbf16>, vector<32x8xbf16>, vector<16x8xf32> -> vector<16x8xf32>
    %c0_3 = arith.constant 0 : index
    %c0_4 = arith.constant 0 : index
    %3 = vector.load %arg4[%c0_3, %c0_4] : memref<1x8xf32, #tpu.memory_space<vmem>>, vector<1x8xf32>
    %4 = vector.broadcast %3 : vector<1x8xf32> to vector<16x8xf32>
    %5 = arith.addf %2, %4 : vector<16x8xf32>
    %c0_5 = arith.constant 0 : index
    %c0_6 = arith.constant 0 : index
    %6 = vector.load %arg5[%c0_5, %c0_6] : memref<16x8xf32, #tpu.memory_space<vmem>>, vector<16x8xf32>
    tpu.vector_store %arg5[%c0_5, %c0_6], %5 {strides = array<i32>} : memref<16x8xf32, #tpu.memory_space<vmem>>, vector<16x8xf32>,
    return
  }
  func.func @transform_0(%arg0: i32, %arg1: i32) -> (i32, i32) {
    %c0_i32 = arith.constant 0 : i32
    %c0_i32_0 = arith.constant 0 : i32
    return %arg0, %c0_i32 : i32, i32
  }
  func.func @transform_1(%arg0: i32, %arg1: i32) -> (i32, i32) {
    %c0_i32 = arith.constant 0 : i32
    %c0_i32_0 = arith.constant 0 : i32
    return %c0_i32, %arg1 : i32, i32
  }
  func.func @transform_2(%arg0: i32, %arg1: i32) -> (i32, i32) {
    %c0_i32 = arith.constant 0 : i32
    %c0_i32_0 = arith.constant 0 : i32
    return %c0_i32, %arg1 : i32, i32
  }
  func.func @transform_3(%arg0: i32, %arg1: i32) -> (i32, i32) {
    %c0_i32 = arith.constant 0 : i32
    return %arg0, %arg1 : i32, i32
  }
}

</mosaic_0001>

<bundles_post_ra>
// kernel: tpu_custom_call.1
= control target key start
LH: loop header
LB: loop body
LE: loop exit
PB: predicated region body
PF: predicated region fallthrough
CT: control target
= control target key end

     0   :  { %v118_v0 = vmov 0.0   ;;  %vm119_vm0 = vmmov 0   ;;  %vm45_vm1 = vcmask 261120   ;;  %vm90_vm2 = vcmask 64512   ;;  %s158_s1 = inlined_call_operand.vmem [shape: bf16[32,8], index: 1, kind: input, shape index: {}]   ;;  %s159_s0 = inlined_call_operand.vmem [shape: bf16[16,32], index: 0, kind: input, shape index: {}]   ;;  %s160_s2 = inlined_call_operand.vmem [shape: f32[1,8], index: 2, kind: input, shape index: {}]   ;;  %s161_s3 = inlined_call_operand.vmem [shape: f32[16,8], index: 3, kind: output, shape index: {}]  }
   0x1   :  { %105 = vmatprep.subr.bf16.mxu0 %v118_v0  ;;  %v115_v1 = vld [vmem:[%s158_s1] sm:$0xff]   ;;  %109 = vmatprep.mubr.msk.bf16.mxu0 %vm119_vm0, %v118_v0  ;;  %v116_v2 = vld [vmem:[%s158_s1 + $0x8] sm:$0xff]  }
   0x2   :  { %106 = vmatpush3.bf16.msra.mxu0 %v115_v1  ;;  %v117_v3 = vld [vmem:[%s159_s0] sm:$0xff]  }
   0x3   :  { %107 = vmatprep.subr.bf16.mxu0 %v118_v0  ;;  %v97_v4 = vld [vmem:[%s160_s2] ss:$0 sm:$0xff] }
   0x6   :  { %108 = vmatpush3.bf16.msra.mxu0 %v116_v2 }
   0x9   :  { %110 = vmatmul.mubr.msk.bf16.vlgmr.msra.gmra.mrb[0].mxu0 %vm45_vm1, %v117_v3 }
  0xdc   :  { %v83_v5 = vpop.f32.mrb[0].mxu0 }
  0xdd   :  { %v84_v6 = vadd.f32 %v97_v4, %v83_v5  ;;  %v111_v7 = vpop.f32.mrb[1].mxu0 }
  0xde   :  { %v86_v8 = vpop.f32.mrb[2].mxu0 }
  0xdf   :  { %91 = vst.msk [vmem:[%s161_s3] sm:$0xff] %vm90_vm2, %v84_v6  ;;  %v87_v9 = vadd.f32 %v97_v4, %v86_v8  ;;  %v112_v10 = vpop.f32.mrb[3].mxu0 }
  0xe1   :  { %92 = vst.msk [vmem:[%s161_s3 + $0x8] sm:$0xff] %vm90_vm2, %v87_v9 }

</bundles_post_ra>
